<compile_context>
chip_gen: v7x
topology: tpu7x:2x2x1
jax: 0.10.0
libtpu: 0.0.40
codegen_flags: <defaults>
</compile_context>

<pallas_src>
import jax
import jax.numpy as jnp
from jax.experimental import pallas as pl
from jax.experimental.pallas import tpu as pltpu


def make_divisible(v, divisor=8, min_value=None, round_limit=0.9):
    min_value = min_value or divisor
    new_v = max(min_value, int(v + divisor / 2) // divisor * divisor)
    if new_v < round_limit * v:
        new_v += divisor
    return new_v


def _se_kernel(x_ref, w1_ref, b1_ref, w2_ref, b2_ref, o_ref):
    # x_ref block: (nb, C, HW); weights are full (tiny) arrays.
    x = x_ref[...]                                            # (nb, C, HW)

    # squeeze: global average pool over spatial (lane axis), f32 accumulation,
    # without materializing a full-tile f32 copy of x.
    x_se = jnp.mean(x, axis=-1, dtype=jnp.float32)            # (nb, C)

    # fc1 (1x1 conv) + bias + ReLU
    h = jnp.dot(x_se, w1_ref[...],
                preferred_element_type=jnp.float32) + b1_ref[...]   # (nb, rd)
    h = jnp.maximum(h, 0.0)

    # fc2 (1x1 conv) + bias + sigmoid gate
    g = jnp.dot(h, w2_ref[...],
                preferred_element_type=jnp.float32) + b2_ref[...]   # (nb, C)
    gate = jax.nn.sigmoid(g).astype(x.dtype)                  # (nb, C)

    # excite: broadcast gate over spatial lanes; multiply in x.dtype
    o_ref[...] = x * gate[:, :, None]


def _pick_batch_block(n, bytes_per_image, vmem_block_budget):
    """Largest divisor of n whose double-buffered in+out blocks fit the budget;
    keep >= 2 grid steps when possible so v7x megacore has work for both TCs."""
    max_nb = max(1, vmem_block_budget // max(1, 4 * bytes_per_image))
    nb = 1
    for d in range(1, n + 1):
        if n % d == 0 and d <= max_nb:
            nb = d
    if n // nb < 2 and n >= 2:
        for d in range(nb, 0, -1):
            if n % d == 0 and n // d >= 2:
                nb = d
                break
    return nb


def squeeze_excite_pallas(x_nchw, w1, b1, w2, b2):
    """x_nchw: (N, C, H, W). w1: (C, rd), b1: (1, rd), w2: (rd, C), b2: (1, C)."""
    N, C, H, W = x_nchw.shape
    HW = H * W
    rd = w1.shape[1]

    # Free reshape: channels on sublanes, flattened spatial on lanes.
    x = x_nchw.reshape(N, C, HW)

    bytes_per_image = C * HW * x.dtype.itemsize
    nb = _pick_batch_block(N, bytes_per_image, vmem_block_budget=24 * 1024 * 1024)
    grid = (N // nb,)

    out = pl.pallas_call(
        _se_kernel,
        out_shape=jax.ShapeDtypeStruct((N, C, HW), x.dtype),
        grid_spec=pltpu.PrefetchScalarGridSpec(
            num_scalar_prefetch=0,
            grid=grid,
            in_specs=[
                pl.BlockSpec((nb, C, HW), lambda n: (n, 0, 0)),
                pl.BlockSpec((C, rd), lambda n: (0, 0)),
                pl.BlockSpec((1, rd), lambda n: (0, 0)),
                pl.BlockSpec((rd, C), lambda n: (0, 0)),
                pl.BlockSpec((1, C), lambda n: (0, 0)),
            ],
            out_specs=pl.BlockSpec((nb, C, HW), lambda n: (n, 0, 0)),
        ),
        compiler_params=pltpu.CompilerParams(
            dimension_semantics=("parallel",),
            vmem_limit_bytes=32 * 1024 * 1024),
        # Output has identical shape/dtype/layout as the (reshaped) input:
        # alias to save an HBM allocation.
        input_output_aliases={0: 0},
    )(x, w1, b1, w2, b2)

    # Free reshape back to NCHW.
    return out.reshape(N, C, H, W)


def squeeze_excite_ref(x, w1, b1, w2, b2):
    """Plain-JAX reference (NCHW), mirrors the PyTorch forward."""
    x_se = jnp.mean(x, axis=(2, 3), keepdims=True)            # (N, C, 1, 1)
    h = jnp.einsum('ncij,cr->nrij', x_se, w1) + b1.reshape(1, -1, 1, 1)
    h = jnp.maximum(h, 0.0)
    g = jnp.einsum('nrij,rc->ncij', h, w2) + b2.reshape(1, -1, 1, 1)
    return x * jax.nn.sigmoid(g)


if __name__ == "__main__":
    key = jax.random.PRNGKey(0)
    N, C, H, W = 2, 4, 16, 16
    rd = make_divisible(C * (1.0 / 16), 8, round_limit=0.0)   # -> 8

    k_x, k_w1, k_b1, k_w2, k_b2 = jax.random.split(key, 5)
    x = jax.random.normal(k_x, (N, C, H, W), dtype=jnp.float32)

    # fc1: Conv(C -> rd, k=1), fc2: Conv(rd -> C, k=1); stored as matmul weights.
    w1 = 0.1 * jax.random.normal(k_w1, (C, rd), dtype=jnp.float32)
    b1 = 0.1 * jax.random.normal(k_b1, (1, rd), dtype=jnp.float32)
    w2 = 0.1 * jax.random.normal(k_w2, (rd, C), dtype=jnp.float32)
    b2 = 0.1 * jax.random.normal(k_b2, (1, C), dtype=jnp.float32)

    se_fn = jax.jit(squeeze_excite_pallas)
    out = se_fn(x, w1, b1, w2, b2)
    out = jax.block_until_ready(out)

    ref = squeeze_excite_ref(x, w1, b1, w2, b2)
    assert out.shape == (N, C, H, W)
    assert jnp.allclose(out, ref, atol=1e-5, rtol=1e-5), "mismatch vs reference"

    print("KERNEL_OK")
</pallas_src>

<mosaic_0001>
module attributes {stable_mosaic.version = 11 : i64} {
  func.func @_se_kernel(%arg0: i32, %arg1: memref<1x4x256xf32, #tpu.memory_space<vmem>>, %arg2: memref<4x8xf32, #tpu.memory_space<vmem>>, %arg3: memref<1x8xf32, #tpu.memory_space<vmem>>, %arg4: memref<8x4xf32, #tpu.memory_space<vmem>>, %arg5: memref<1x4xf32, #tpu.memory_space<vmem>>, %arg6: memref<1x4x256xf32, #tpu.memory_space<vmem>>) attributes {dimension_semantics = [#tpu.dimension_semantics<parallel>], iteration_bounds = array<i64: 2>, scalar_prefetch = 0 : i64, scratch_operands = 0 : i64, tpu.core_type = #tpu.core_type<tc>, window_params = [{transform_indices = @transform_0, window_bounds = array<i64: 1, 4, 256>}, {pipeline_mode = #tpu.pipeline_mode<synchronous>, transform_indices = @transform_1, window_bounds = array<i64: 4, 8>}, {pipeline_mode = #tpu.pipeline_mode<synchronous>, transform_indices = @transform_2, window_bounds = array<i64: 1, 8>}, {pipeline_mode = #tpu.pipeline_mode<synchronous>, transform_indices = @transform_3, window_bounds = array<i64: 8, 4>}, {pipeline_mode = #tpu.pipeline_mode<synchronous>, transform_indices = @transform_4, window_bounds = array<i64: 1, 4>}, {transform_indices = @transform_5, window_bounds = array<i64: 1, 4, 256>}]} {
    %c0 = arith.constant 0 : index
    %c0_0 = arith.constant 0 : index
    %c0_1 = arith.constant 0 : index
    %0 = vector.load %arg1[%c0, %c0_0, %c0_1] : memref<1x4x256xf32, #tpu.memory_space<vmem>>, vector<1x4x256xf32>
    %cst = arith.constant dense<0.000000e+00> : vector<1x4xf32>
    %1 = vector.multi_reduction <add>, %0, %cst [2] : vector<1x4x256xf32> to vector<1x4xf32>
    %cst_2 = arith.constant 2.560000e+02 : f32
    %2 = vector.broadcast %cst_2 : f32 to vector<1x4xf32>
    %3 = arith.divf %1, %2 : vector<1x4xf32>
    %c0_3 = arith.constant 0 : index
    %c0_4 = arith.constant 0 : index
    %4 = vector.load %arg2[%c0_3, %c0_4] : memref<4x8xf32, #tpu.memory_space<vmem>>, vector<4x8xf32>
    %cst_5 = arith.constant dense<0.000000e+00> : vector<1x8xf32>
    %5 = tpu.matmul %3, %4, %cst_5 {dimension_numbers = #tpu.dot_dimension_numbers<[1], [0], [0], [1], [0, 0, 1, 1], [], []>} : vector<1x4xf32>, vector<4x8xf32>, vector<1x8xf32> -> vector<1x8xf32>
    %c0_6 = arith.constant 0 : index
    %c0_7 = arith.constant 0 : index
    %6 = vector.load %arg3[%c0_6, %c0_7] : memref<1x8xf32, #tpu.memory_space<vmem>>, vector<1x8xf32>
    %7 = arith.addf %5, %6 : vector<1x8xf32>
    %cst_8 = arith.constant 0.000000e+00 : f32
    %8 = vector.broadcast %cst_8 : f32 to vector<1x8xf32>
    %9 = arith.maximumf %7, %8 : vector<1x8xf32>
    %c0_9 = arith.constant 0 : index
    %c0_10 = arith.constant 0 : index
    %10 = vector.load %arg4[%c0_9, %c0_10] : memref<8x4xf32, #tpu.memory_space<vmem>>, vector<8x4xf32>
    %cst_11 = arith.constant dense<0.000000e+00> : vector<1x4xf32>
    %11 = tpu.matmul %9, %10, %cst_11 {dimension_numbers = #tpu.dot_dimension_numbers<[1], [0], [0], [1], [0, 0, 1, 1], [], []>} : vector<1x8xf32>, vector<8x4xf32>, vector<1x4xf32> -> vector<1x4xf32>
    %c0_12 = arith.constant 0 : index
    %c0_13 = arith.constant 0 : index
    %12 = vector.load %arg5[%c0_12, %c0_13] : memref<1x4xf32, #tpu.memory_space<vmem>>, vector<1x4xf32>
    %13 = arith.addf %11, %12 : vector<1x4xf32>
    %14 = arith.negf %13 : vector<1x4xf32>
    %15 = math.exp %14 : vector<1x4xf32>
    %cst_14 = arith.constant 1.000000e+00 : f32
    %16 = vector.broadcast %cst_14 : f32 to vector<1x4xf32>
    %17 = arith.addf %16, %15 : vector<1x4xf32>
    %18 = arith.divf %16, %17 : vector<1x4xf32>
    %19 = vector.shape_cast %18 : vector<1x4xf32> to vector<1x4x1xf32>
    %20 = vector.broadcast %19 : vector<1x4x1xf32> to vector<1x4x256xf32>
    %21 = arith.mulf %0, %20 : vector<1x4x256xf32>
    %c0_15 = arith.constant 0 : index
    %c0_16 = arith.constant 0 : index
    %c0_17 = arith.constant 0 : index
    %22 = vector.load %arg6[%c0_15, %c0_16, %c0_17] : memref<1x4x256xf32, #tpu.memory_space<vmem>>, vector<1x4x256xf32>
    tpu.vector_store %arg6[%c0_15, %c0_16, %c0_17], %21 {strides = array<i32>} : memref<1x4x256xf32, #tpu.memory_space<vmem>>, vector<1x4x256xf32>,
    return
  }
  func.func @transform_0(%arg0: i32) -> (i32, i32, i32) {
    %c0_i32 = arith.constant 0 : i32
    %c0_i32_0 = arith.constant 0 : i32
    %c0_i32_1 = arith.constant 0 : i32
    return %arg0, %c0_i32, %c0_i32_0 : i32, i32, i32
  }
  func.func @transform_1(%arg0: i32) -> (i32, i32) {
    %c0_i32 = arith.constant 0 : i32
    %c0_i32_0 = arith.constant 0 : i32
    %c0_i32_1 = arith.constant 0 : i32
    return %c0_i32, %c0_i32_0 : i32, i32
  }
  func.func @transform_2(%arg0: i32) -> (i32, i32) {
    %c0_i32 = arith.constant 0 : i32
    %c0_i32_0 = arith.constant 0 : i32
    %c0_i32_1 = arith.constant 0 : i32
    return %c0_i32, %c0_i32_0 : i32, i32
  }
  func.func @transform_3(%arg0: i32) -> (i32, i32) {
    %c0_i32 = arith.constant 0 : i32
    %c0_i32_0 = arith.constant 0 : i32
    %c0_i32_1 = arith.constant 0 : i32
    return %c0_i32, %c0_i32_0 : i32, i32
  }
  func.func @transform_4(%arg0: i32) -> (i32, i32) {
    %c0_i32 = arith.constant 0 : i32
    %c0_i32_0 = arith.constant 0 : i32
    %c0_i32_1 = arith.constant 0 : i32
    return %c0_i32, %c0_i32_0 : i32, i32
  }
  func.func @transform_5(%arg0: i32) -> (i32, i32, i32) {
    %c0_i32 = arith.constant 0 : i32
    %c0_i32_0 = arith.constant 0 : i32
    %c0_i32_1 = arith.constant 0 : i32
    return %arg0, %c0_i32, %c0_i32_0 : i32, i32, i32
  }
}

</mosaic_0001>

<bundles_post_ra>
// kernel: squeeze_excite_pallas.1
= control target key start
LH: loop header
LB: loop body
LE: loop exit
PB: predicated region body
PF: predicated region fallthrough
CT: control target
= control target key end

     0   :  { %s566_s18 = smov 0   ;;  %s602_s0 = inlined_call_operand.vmem [shape: f32[2,4,256], index: 0, kind: input, shape index: {}, may-alias: {0,5}]   ;;  %s603_s1 = inlined_call_operand.vmem [shape: f32[4,8], index: 1, kind: input, shape index: {}]   ;;  %s604_s2 = inlined_call_operand.vmem [shape: f32[1,8], index: 2, kind: input, shape index: {}]   ;;  %s605_s3 = inlined_call_operand.vmem [shape: f32[8,4], index: 3, kind: input, shape index: {}]   ;;  %s606_s4 = inlined_call_operand.vmem [shape: f32[1,4], index: 4, kind: input, shape index: {}]   ;;  %s607_s5 = inlined_call_operand.vmem [shape: f32[2,4,256], index: 5, kind: output, shape index: {}, may-alias: {0,5}]  }
   0x1 LB: > { %s478_s19 = sadd.s32 4294967295, %s531_s18   ;;  %p482_p0 = scmp.ge.s32.totalorder %s531_s18, 1  ;;  %s531_s18 = sphi %s566_s18, %s15_s18  }
   0x2   : > { %p187_p1 = scmp.lt.s32.totalorder %s531_s18, 3 }
   0x4   : > { %p188_p2 = pnand %p482_p0, %p187_p1 }
   0x5   : > { %p215_p3 = scmp.lt.s32.totalorder (!%p188_p2), %s478_s19, 1  ;;  %vm229_vm0 = vcmask (!%p188_p2), 1043456   ;;  %v533_v5 = vmov (!%p188_p2), 0.0   ;;  %v237_v6 = vld [vmem:[%s603_s1] sm:$0xf] (!%p188_p2)  ;;  %vm534_vm1 = vmmov (!%p188_p2), 0   ;;  %v240_v7 = vlaneseq (!%p188_p2) }
   0x6   : > { %191 = sbr.rel (%p188_p2) target bundleno = 746 (0x2ea), region = 40  ;;  %499 = vmatprep.subr.mxu0 (!%p188_p2), %v533_v5  ;;  %504 = vmatprep.subr.mxu1 (!%p188_p2), %v533_v5  ;;  %vm246_vm2 = vcmask (!%p188_p2), 31744   ;;  %v323_v14 = vld [vmem:[%s605_s3] sm:$0xff] (!%p188_p2)  ;;  %vm325_vm3 = vcmask (!%p188_p2), 64512   ;;  %v535_v30 = vmov (!%p188_p2), 839922192  }
   0x7   : > { %500 = vmatpush3.msk.msra.mxu0 (!%p188_p2), %vm229_vm0, %v237_v6  ;;  %501 = vmatprep.mubr.msk.f32.mxu0 (!%p188_p2), %vm534_vm1, %v533_v5  ;;  %v241_v8 = vand.u32 (!%p188_p2), 127, %v240_v7  ;;  %v243_v9 = vshrl.u32 (!%p188_p2), %v240_v7, 7  ;;  %v238_v15 = vld [vmem:[%s604_s2] sm:$0x1] (!%p188_p2)  ;;  %v414_v31 = vunpack.c.l.s4 (!%p188_p2), %v535_v30 }
   0x8   : > { %506 = vmatprep.mubr.msk.f32.mxu1 (!%p188_p2), %vm534_vm1, %v533_v5  ;;  %505 = vmatpush3.msra.mxu1 (!%p188_p2), %v323_v14  ;;  %v324_v20 = vld [vmem:[%s606_s4] sm:$0x1] (!%p188_p2) }
   0x9   : > { %v244_v10 = vsub.s32 (!%p188_p2), %v241_v8, %v243_v9  ;;  %v407_v27 = vsub.s32 (!%p188_p2), 0, %v243_v9  ;;  %v415_v32 = vunpack.c.0.s8 (!%p188_p2), %v414_v31 }
   0xb   : > { %v418_v33 = vsub.s32 (!%p188_p2), %v415_v32, %v243_v9 }
   0xd   : > { %s609_s19 = smov (!%p215_p3, %s478_s19), 1 }
   0xe   : > { %s493_s20 = sshll.u32 %s609_s19, 3 }
   0xf   : > { %s219_s23 = scalar_lea.vmem %s602_s0, %s493_s20  ;;  %s224_s9 = scalar_lea.vmem %s607_s5, %s493_s20 }
  0x10   : > { %v225_v0 = vld [vmem:[%s219_s23] sm:$0xff] }
  0x11   : > { %v227_v1 = vcombine.high %v225_v0, %v225_v0  ;;  %v230_v2 = vsel %vm229_vm0, %v225_v0, 0.0 }
  0x13   : > { %v231_v3 = vsel %vm229_vm0, %v227_v1, 0.0 }
  0x14   : > { %v232_v4 = vadd.f32 %v231_v3, %v230_v2 }
  0x16   : > { %233 = vadd.xlane.f32.xlu0 %v232_v4 }
  0xa3   : > { %v234_v11 = vpop.xlane.xlu0 %233 }
  0xa4   : > { %v236_v12 = vmul.f32 0.00390625, %v234_v11 }
  0xa6   : > { %v245_v13 = vrot.slane %v236_v12, %v244_v10 }
  0xa8   : > { %502 = vmatmul.mubr.msk.f32.vlgmr.msra.gmra.mrb[0].mxu0 %vm246_vm2, %v245_v13 }
 0x17b   : > { %v318_v16 = vpop.f32.mrb[0].mxu0 }
 0x17c   : > { %v319_v17 = vadd.f32 %v318_v16, %v238_v15  ;;  %v503_v18 = vpop.f32.mrb[1].mxu0 }
 0x17e   : > { %v322_v19 = vmax.f32 %v319_v17, 0.0 }
 0x180   : > { %507 = vmatmul.mubr.msk.f32.vlgmr.msra.gmra.mrb[0].mxu1 %vm325_vm3, %v322_v19 }
 0x253   : > { %v395_v21 = vpop.f32.mrb[0].mxu1 }
 0x254   : > { %v396_v22 = vadd.f32 %v395_v21, %v324_v20  ;;  %v508_v23 = vpop.f32.mrb[1].mxu1 }
 0x256   : > { %v490_v24 = vmul.f32 -1.442695, %v396_v22 }
 0x258   : > { %521 = vpow2.f32 %v490_v24 }
 0x262   : > { %v522_v25 = vpop.eup %521 }
 0x263   : > { %v402_v26 = vadd.f32 1.0, %v522_v25 }
 0x265   : > { %523 = vrcp.f32 %v402_v26 }
 0x26f   : > { %v524_v28 = vpop.eup %523 }
 0x270   : > { %v408_v29 = vrot.slane %v524_v28, %v407_v27 }
 0x272   : > { %410 = vbcast.lane.b32.xlu0 %v408_v29, 256 }
 0x2e4   : > { %v411_v34 = vpop.permute.xlu0 %410 }
 0x2e5   : > { %v419_v35 = vrot.slane %v411_v34, %v418_v33 }
 0x2e7   : > { %v421_v36 = vmul.f32 %v419_v35, %v225_v0 }
 0x2e9   : > { %422 = vst [vmem:[%s224_s9] sm:$0xff] %v421_v36 }
 0x2ea PF: > { %s15_s18 = sadd.s32 1, %s531_s18  }
 0x2eb   : > { %p12_p4 = scmp.ge.s32.totalorder %s15_s18, 4  }
 0x2ed   :  { %14 = sbr.rel (!%p12_p4) target bundleno = 1 (0x1), region = 70 }

</bundles_post_ra>
